<compile_context>
chip_gen: v5e
topology: v5e:2x2
jax: 0.10.0
libtpu: 0.0.40
codegen_flags: <defaults>
</compile_context>

<pallas_src>
import functools

import jax
import jax.numpy as jnp
from jax.experimental import pallas as pl
from jax.experimental.pallas import tpu as pltpu


def _round_up(x, m):
    return ((x + m - 1) // m) * m


def _mlp_kernel(x_ref, wf_ref, bf_ref, w1_ref, b1_ref, wout_ref, bout_ref, o_ref):
    cdt = wf_ref.dtype  # bf16 compute dtype for MXU operands
    # fused (input_layer ; h0): no activation between them in the PyTorch forward,
    # so x @ w_in @ w0 + (b_in @ w0 + b0) == x @ W_f + b_f
    h = jnp.dot(x_ref[...].astype(cdt), wf_ref[...],
                preferred_element_type=jnp.float32) + bf_ref[...]
    h = jnp.maximum(h, 0.0)          # h0_act
    # h1 + ReLU (bf16 operands, f32 accumulation; bias add / ReLU in f32)
    h = jnp.dot(h.astype(cdt), w1_ref[...],
                preferred_element_type=jnp.float32) + b1_ref[...]
    h = jnp.maximum(h, 0.0)          # h1_act
    # output_layer (lane-padded to a multiple of 128 -> unmasked full-lane stores)
    out = jnp.dot(h.astype(cdt), wout_ref[...],
                  preferred_element_type=jnp.float32) + bout_ref[...]
    o_ref[...] = out.astype(o_ref.dtype)


def prepare_params(params, compute_dtype=jnp.bfloat16):
    """One-time weight prep (call once, reuse across forward calls):
       * fuse input_layer + h0 in f32,
       * lane-pad the output layer to a multiple of 128,
       * cast matmul weights to the MXU compute dtype (biases stay f32)."""
    cdt = jnp.dtype(compute_dtype)
    output_dim = params["w_out"].shape[1]
    out_pad = _round_up(output_dim, 128)

    # Fuse the two activation-free Linears in f32 (more accurate than per-layer bf16).
    w_f = jnp.dot(params["w_in"], params["w0"])                       # (input_dim, n)
    b_f = jnp.dot(params["b_in"], params["w0"]) + params["b0"]        # (1, n)

    w_out = jnp.pad(params["w_out"], ((0, 0), (0, out_pad - output_dim)))
    b_out = jnp.pad(params["b_out"], ((0, 0), (0, out_pad - output_dim)))

    return dict(
        w_f=w_f.astype(cdt), b_f=b_f.astype(jnp.float32),
        w1=params["w1"].astype(cdt), b1=params["b1"].astype(jnp.float32),
        w_out=w_out.astype(cdt), b_out=b_out.astype(jnp.float32),
    )


@functools.partial(jax.jit, static_argnames=("output_dim", "batch_tile"))
def dynamics_net_forward(x, prep, output_dim, batch_tile=512):
    """x: (B, input_dim) float32. prep: output of prepare_params()."""
    B, input_dim = x.shape
    n = prep["w1"].shape[0]
    out_pad = prep["w_out"].shape[1]

    # Batch tile: single grid step whenever B fits in one tile (no useless splits on
    # single-TC chips; on v7x a split only helps once each step is a full large tile).
    # Round to a multiple of 16 for bf16 sublane packing; partial tiles are masked.
    tb = min(_round_up(batch_tile, 16), _round_up(B, 16))
    grid = (pl.cdiv(B, tb),)

    def bcast(shape):
        # weights / biases: same block for every batch tile (constant index_map)
        return pl.BlockSpec(shape, lambda i: (0, 0))

    out = pl.pallas_call(
        _mlp_kernel,
        out_shape=jax.ShapeDtypeStruct((B, out_pad), jnp.float32),
        grid_spec=pltpu.PrefetchScalarGridSpec(
            num_scalar_prefetch=0,
            grid=grid,
            in_specs=[
                pl.BlockSpec((tb, input_dim), lambda i: (i, 0)),  # x tile
                bcast((input_dim, n)),                            # W_f (fused)
                bcast((1, n)),                                    # b_f (fused)
                bcast((n, n)),                                    # w1
                bcast((1, n)),                                    # b1
                bcast((n, out_pad)),                              # w_out (lane-padded)
                bcast((1, out_pad)),                              # b_out (lane-padded)
            ],
            out_specs=pl.BlockSpec((tb, out_pad), lambda i: (i, 0)),
        ),
        compiler_params=pltpu.CompilerParams(
            dimension_semantics=("parallel",)),
    )(x, prep["w_f"], prep["b_f"], prep["w1"], prep["b1"],
      prep["w_out"], prep["b_out"])

    # Slice back to the real output width (padded columns are exact zeros + zero bias).
    return out[:, :output_dim].astype(x.dtype)


def init_params(key, input_dim, output_dim, n_neurons):
    """PyTorch-Linear-style init (uniform(-1/sqrt(fan_in), 1/sqrt(fan_in))), weights
    stored transposed relative to torch, i.e. (in_features, out_features)."""
    def linear(k, fan_in, fan_out):
        kw, kb = jax.random.split(k)
        bound = 1.0 / jnp.sqrt(fan_in)
        w = jax.random.uniform(kw, (fan_in, fan_out), jnp.float32, -bound, bound)
        b = jax.random.uniform(kb, (1, fan_out), jnp.float32, -bound, bound)
        return w, b

    k_in, k0, k1, k_out = jax.random.split(key, 4)
    w_in, b_in = linear(k_in, input_dim, n_neurons)
    w0, b0 = linear(k0, n_neurons, n_neurons)
    w1, b1 = linear(k1, n_neurons, n_neurons)
    w_out, b_out = linear(k_out, n_neurons, output_dim)
    return dict(w_in=w_in, b_in=b_in, w0=w0, b0=b0,
                w1=w1, b1=b1, w_out=w_out, b_out=b_out)


def reference_forward(x, p):
    """Pure-JAX f32 reference with the exact PyTorch forward semantics
    (per-layer, no fusion, no bf16)."""
    h = jnp.dot(x, p["w_in"]) + p["b_in"]
    h = jnp.dot(h, p["w0"]) + p["b0"]
    h = jnp.maximum(h, 0.0)
    h = jnp.dot(h, p["w1"]) + p["b1"]
    h = jnp.maximum(h, 0.0)
    return jnp.dot(h, p["w_out"]) + p["b_out"]


if __name__ == "__main__":
    input_dim = 32
    output_dim = 16
    n_neurons = 512
    batch = 8

    key = jax.random.PRNGKey(0)
    k_params, k_x = jax.random.split(key)
    params = init_params(k_params, input_dim, output_dim, n_neurons)
    prep = prepare_params(params)          # one-time: fuse + cast + pad
    x = jax.random.normal(k_x, (batch, input_dim), jnp.float32)

    out = dynamics_net_forward(x, prep, output_dim=output_dim)
    out = jax.block_until_ready(out)

    ref = reference_forward(x, params)
    assert out.shape == (batch, output_dim)
    # bf16 MXU operands + f32-fused first two layers vs exact f32 per-layer reference.
    assert jnp.allclose(out, ref, atol=3e-2, rtol=3e-2), "mismatch vs reference"

    print("KERNEL_OK")
</pallas_src>

<mosaic_0001>
module attributes {stable_mosaic.version = 11 : i64} {
  func.func @_mlp_kernel(%arg0: i32, %arg1: memref<16x32xf32, #tpu.memory_space<vmem>>, %arg2: memref<32x512xbf16, #tpu.memory_space<vmem>>, %arg3: memref<1x512xf32, #tpu.memory_space<vmem>>, %arg4: memref<512x512xbf16, #tpu.memory_space<vmem>>, %arg5: memref<1x512xf32, #tpu.memory_space<vmem>>, %arg6: memref<512x128xbf16, #tpu.memory_space<vmem>>, %arg7: memref<1x128xf32, #tpu.memory_space<vmem>>, %arg8: memref<16x128xf32, #tpu.memory_space<vmem>>) attributes {dimension_semantics = [#tpu.dimension_semantics<parallel>], iteration_bounds = array<i64: 1>, scalar_prefetch = 0 : i64, scratch_operands = 0 : i64, tpu.core_type = #tpu.core_type<tc>, window_params = [{transform_indices = @transform_0, window_bounds = array<i64: 16, 32>}, {pipeline_mode = #tpu.pipeline_mode<synchronous>, transform_indices = @transform_1, window_bounds = array<i64: 32, 512>}, {pipeline_mode = #tpu.pipeline_mode<synchronous>, transform_indices = @transform_2, window_bounds = array<i64: 1, 512>}, {pipeline_mode = #tpu.pipeline_mode<synchronous>, transform_indices = @transform_3, window_bounds = array<i64: 512, 512>}, {pipeline_mode = #tpu.pipeline_mode<synchronous>, transform_indices = @transform_4, window_bounds = array<i64: 1, 512>}, {pipeline_mode = #tpu.pipeline_mode<synchronous>, transform_indices = @transform_5, window_bounds = array<i64: 512, 128>}, {pipeline_mode = #tpu.pipeline_mode<synchronous>, transform_indices = @transform_6, window_bounds = array<i64: 1, 128>}, {transform_indices = @transform_7, window_bounds = array<i64: 16, 128>}]} {
    %c0 = arith.constant 0 : index
    %c0_0 = arith.constant 0 : index
    %0 = vector.load %arg1[%c0, %c0_0] : memref<16x32xf32, #tpu.memory_space<vmem>>, vector<16x32xf32>
    %1 = arith.truncf %0 : vector<16x32xf32> to vector<16x32xbf16>
    %c0_1 = arith.constant 0 : index
    %c0_2 = arith.constant 0 : index
    %2 = vector.load %arg2[%c0_1, %c0_2] : memref<32x512xbf16, #tpu.memory_space<vmem>>, vector<32x512xbf16>
    %cst = arith.constant dense<0.000000e+00> : vector<16x512xf32>
    %3 = tpu.matmul %1, %2, %cst {dimension_numbers = #tpu.dot_dimension_numbers<[1], [0], [0], [1], [0, 0, 1, 1], [], []>} : vector<16x32xbf16>, vector<32x512xbf16>, vector<16x512xf32> -> vector<16x512xf32>
    %c0_3 = arith.constant 0 : index
    %c0_4 = arith.constant 0 : index
    %4 = vector.load %arg3[%c0_3, %c0_4] : memref<1x512xf32, #tpu.memory_space<vmem>>, vector<1x512xf32>
    %5 = vector.broadcast %4 : vector<1x512xf32> to vector<16x512xf32>
    %6 = arith.addf %3, %5 : vector<16x512xf32>
    %cst_5 = arith.constant 0.000000e+00 : f32
    %7 = vector.broadcast %cst_5 : f32 to vector<16x512xf32>
    %8 = arith.maximumf %6, %7 : vector<16x512xf32>
    %9 = arith.truncf %8 : vector<16x512xf32> to vector<16x512xbf16>
    %c0_6 = arith.constant 0 : index
    %c0_7 = arith.constant 0 : index
    %10 = vector.load %arg4[%c0_6, %c0_7] : memref<512x512xbf16, #tpu.memory_space<vmem>>, vector<512x512xbf16>
    %cst_8 = arith.constant dense<0.000000e+00> : vector<16x512xf32>
    %11 = tpu.matmul %9, %10, %cst_8 {dimension_numbers = #tpu.dot_dimension_numbers<[1], [0], [0], [1], [0, 0, 1, 1], [], []>} : vector<16x512xbf16>, vector<512x512xbf16>, vector<16x512xf32> -> vector<16x512xf32>
    %c0_9 = arith.constant 0 : index
    %c0_10 = arith.constant 0 : index
    %12 = vector.load %arg5[%c0_9, %c0_10] : memref<1x512xf32, #tpu.memory_space<vmem>>, vector<1x512xf32>
    %13 = vector.broadcast %12 : vector<1x512xf32> to vector<16x512xf32>
    %14 = arith.addf %11, %13 : vector<16x512xf32>
    %cst_11 = arith.constant 0.000000e+00 : f32
    %15 = vector.broadcast %cst_11 : f32 to vector<16x512xf32>
    %16 = arith.maximumf %14, %15 : vector<16x512xf32>
    %17 = arith.truncf %16 : vector<16x512xf32> to vector<16x512xbf16>
    %c0_12 = arith.constant 0 : index
    %c0_13 = arith.constant 0 : index
    %18 = vector.load %arg6[%c0_12, %c0_13] : memref<512x128xbf16, #tpu.memory_space<vmem>>, vector<512x128xbf16>
    %cst_14 = arith.constant dense<0.000000e+00> : vector<16x128xf32>
    %19 = tpu.matmul %17, %18, %cst_14 {dimension_numbers = #tpu.dot_dimension_numbers<[1], [0], [0], [1], [0, 0, 1, 1], [], []>} : vector<16x512xbf16>, vector<512x128xbf16>, vector<16x128xf32> -> vector<16x128xf32>
    %c0_15 = arith.constant 0 : index
    %c0_16 = arith.constant 0 : index
    %20 = vector.load %arg7[%c0_15, %c0_16] : memref<1x128xf32, #tpu.memory_space<vmem>>, vector<1x128xf32>
    %21 = vector.broadcast %20 : vector<1x128xf32> to vector<16x128xf32>
    %22 = arith.addf %19, %21 : vector<16x128xf32>
    %c0_17 = arith.constant 0 : index
    %c0_18 = arith.constant 0 : index
    %23 = vector.load %arg8[%c0_17, %c0_18] : memref<16x128xf32, #tpu.memory_space<vmem>>, vector<16x128xf32>
    tpu.vector_store %arg8[%c0_17, %c0_18], %22 {strides = array<i32>} : memref<16x128xf32, #tpu.memory_space<vmem>>, vector<16x128xf32>,
    return
  }
  func.func @transform_0(%arg0: i32) -> (i32, i32) {
    %c0_i32 = arith.constant 0 : i32
    %c0_i32_0 = arith.constant 0 : i32
    return %arg0, %c0_i32 : i32, i32
  }
  func.func @transform_1(%arg0: i32) -> (i32, i32) {
    %c0_i32 = arith.constant 0 : i32
    %c0_i32_0 = arith.constant 0 : i32
    %c0_i32_1 = arith.constant 0 : i32
    return %c0_i32, %c0_i32_0 : i32, i32
  }
  func.func @transform_2(%arg0: i32) -> (i32, i32) {
    %c0_i32 = arith.constant 0 : i32
    %c0_i32_0 = arith.constant 0 : i32
    %c0_i32_1 = arith.constant 0 : i32
    return %c0_i32, %c0_i32_0 : i32, i32
  }
  func.func @transform_3(%arg0: i32) -> (i32, i32) {
    %c0_i32 = arith.constant 0 : i32
    %c0_i32_0 = arith.constant 0 : i32
    %c0_i32_1 = arith.constant 0 : i32
    return %c0_i32, %c0_i32_0 : i32, i32
  }
  func.func @transform_4(%arg0: i32) -> (i32, i32) {
    %c0_i32 = arith.constant 0 : i32
    %c0_i32_0 = arith.constant 0 : i32
    %c0_i32_1 = arith.constant 0 : i32
    return %c0_i32, %c0_i32_0 : i32, i32
  }
  func.func @transform_5(%arg0: i32) -> (i32, i32) {
    %c0_i32 = arith.constant 0 : i32
    %c0_i32_0 = arith.constant 0 : i32
    %c0_i32_1 = arith.constant 0 : i32
    return %c0_i32, %c0_i32_0 : i32, i32
  }
  func.func @transform_6(%arg0: i32) -> (i32, i32) {
    %c0_i32 = arith.constant 0 : i32
    %c0_i32_0 = arith.constant 0 : i32
    %c0_i32_1 = arith.constant 0 : i32
    return %c0_i32, %c0_i32_0 : i32, i32
  }
  func.func @transform_7(%arg0: i32) -> (i32, i32) {
    %c0_i32 = arith.constant 0 : i32
    %c0_i32_0 = arith.constant 0 : i32
    return %arg0, %c0_i32 : i32, i32
  }
}

</mosaic_0001>

<bundles_post_ra>
// kernel: dynamics_net_forward.1
= control target key start
LH: loop header
LB: loop body
LE: loop exit
PB: predicated region body
PF: predicated region fallthrough
CT: control target
= control target key end

     0   :  { %12 = vsyncpa [#allocation3], 0  ;;  %s2758_s0 = inlined_call_operand.hbm [shape: f32[8,32], index: 0, kind: input, shape index: {}]   ;;  %s2759_s1 = inlined_call_operand.hbm [shape: bf16[32,512], index: 1, kind: input, shape index: {}]   ;;  %s2760_s2 = inlined_call_operand.hbm [shape: f32[1,512], index: 2, kind: input, shape index: {}]   ;;  %s2761_s3 = inlined_call_operand.hbm [shape: bf16[512,512], index: 3, kind: input, shape index: {}]   ;;  %s2762_s4 = inlined_call_operand.hbm [shape: f32[1,512], index: 4, kind: input, shape index: {}]   ;;  %s2763_s5 = inlined_call_operand.hbm [shape: bf16[512,128], index: 5, kind: input, shape index: {}]   ;;  %s2764_s6 = inlined_call_operand.vmem [shape: f32[1,128], index: 6, kind: input, shape index: {}]   ;;  %s2765_s7 = inlined_call_operand.hbm [shape: f32[8,128], index: 7, kind: output, shape index: {}]  }
   0x1   :  { %13 = vsyncpa [#allocation6], 0 }
   0x2   :  { %14 = vsyncpa [#allocation9], 0 }
   0x3   :  { %15 = vsyncpa [#allocation12], 0 }
   0x4   :  { %16 = vsyncpa [#allocation4], 0  ;;  %s34_s26 = sshll.u32 %s2759_s1, 4  ;;  %s35_s26 = int_to_ptr.hbm [resolvable:$true] %s34_s26 }
   0x5   :  { %20 = vsyncadd [#allocation3], 128  ;;  %s2641_s27 = smov [#allocation5]   ;;  %s58_s8 = sshll.u32 %s2761_s3, 4  ;;  %s59_s8 = int_to_ptr.hbm [resolvable:$true] %s58_s8 }
   0x6   :  { %s36_s28 = sshll.u32 %s2641_s27, 4  ;;  %s2642_s9 = smov 256   ;;  %s37_s28 = int_to_ptr.vmem [resolvable:$true] %s36_s28 }
   0x7   :  { %s2643_s10 = smov 16   ;;  %s2644_s11 = smov [#allocation8]  }
   0x8   :  { %42 = dma.hbm_to_vmem [thread:$0]  %s35_s26, 1024, %s37_s28, [#allocation6], %s2642_s9, %s2642_s9, %s2643_s10  }
   0x9   :  { %s60_s12 = sshll.u32 %s2644_s11, 4  ;;  %s21_s15 = sshll.u32 %s2758_s0, 4  ;;  %s61_s12 = int_to_ptr.vmem [resolvable:$true] %s60_s12  ;;  %s22_s15 = int_to_ptr.hbm [resolvable:$true] %s21_s15 }
   0xa   :  { %66 = dma.hbm_to_vmem [thread:$0]  %s59_s8, 16384, %s61_s12, [#allocation9], %s2642_s9, %s2642_s9, %s2643_s10  }
   0xb   :  { %s2645_s1 = smov [#allocation2]   ;;  %s48_s3 = sshll.u32 %s2760_s2, 4  ;;  %s49_s3 = int_to_ptr.hbm [resolvable:$true] %s48_s3 }
   0xc   :  { %s23_s16 = sshll.u32 %s2645_s1, 4  ;;  %s2646_s19 = smov 128   ;;  %s24_s16 = int_to_ptr.vmem [resolvable:$true] %s23_s16 }
   0xd   :  { %s2647_s20 = smov 8   ;;  %s2648_s21 = smov [#allocation7]  }
   0xe   :  { %29 = dma.hbm_to_vmem [thread:$0]  %s22_s15, 128, %s24_s16, [#allocation3], %s2646_s19, %s2646_s19, %s2647_s20  }
   0xf   :  { %s50_s22 = sshll.u32 %s2648_s21, 4  ;;  %s72_s24 = sshll.u32 %s2762_s4, 4  ;;  %s51_s22 = int_to_ptr.vmem [resolvable:$true] %s50_s22  ;;  %s73_s24 = int_to_ptr.hbm [resolvable:$true] %s72_s24 }
  0x10   :  { %53 = dma.hbm_to_vmem [thread:$0]  %s49_s3, 64, %s51_s22, [#allocation6]  }
  0x11   :  { %s82_s2 = sshll.u32 %s2763_s5, 4  ;;  %s2649_s27 = smov [#allocation10]   ;;  %s83_s2 = int_to_ptr.hbm [resolvable:$true] %s82_s2 }
  0x12   :  { %s74_s28 = sshll.u32 %s2649_s27, 4  ;;  %s2650_s29 = smov [#allocation11]   ;;  %s75_s28 = int_to_ptr.vmem [resolvable:$true] %s74_s28 }
  0x13   :  { %77 = dma.hbm_to_vmem [thread:$0]  %s73_s24, 64, %s75_s28, [#allocation9]  }
  0x14   :  { %s84_s30 = sshll.u32 %s2650_s29, 4  ;;  %s2651_s8 = smov 64   ;;  %s85_s30 = int_to_ptr.vmem [resolvable:$true] %s84_s30 }
  0x15   :  { %s2652_s9 = smov 4  }
  0x16   :  { %90 = dma.hbm_to_vmem [thread:$0]  %s83_s2, 4096, %s85_s30, [#allocation12], %s2651_s8, %s2651_s8, %s2652_s9  }
  0x17   :  { %2631 = dma.done.wait [#allocation3], 256  }
  0x18   :  { %2632 = vsyncadd [#allocation3], 4294967040 }
  0x19   :  { %2633 = dma.done.wait [#allocation6], 1088  }
  0x1a   :  { %2634 = vsyncadd [#allocation6], 4294966208 }
  0x1b   :  { %2635 = dma.done.wait [#allocation9], 16448  }
  0x1c   :  { %2636 = vsyncadd [#allocation9], 4294950848 }
  0x1d   :  { %2637 = dma.done.wait [#allocation12], 4096  }
  0x1e   :  { %2638 = vsyncadd [#allocation12], 4294963200  ;;  %v1623_v0 = vld [vmem:[#allocation5 + $0x20] sm:$0xf]  ;;  %v2287_v1 = vld [vmem:[#allocation5 + $0x2c] sm:$0xf0] }
  0x1f   :  { %v2285_v2 = vld [vmem:[#allocation5 + $0x24] sm:$0xf]  ;;  %v1624_v3 = vor.u32 %v2287_v1, %v1623_v0  ;;  %v1625_v4 = vld [vmem:[#allocation5 + $0x30] sm:$0xf0]  ;;  %v1631_v5 = vld [vmem:[#allocation5 + $0x28] sm:$0xf] }
  0x20   :  { %v2288_v6 = vld [vmem:[#allocation5 + $0x34] sm:$0xf0]  ;;  %v1628_v7 = vor.u32 %v2285_v2, %v1625_v4  ;;  %v2286_v9 = vld [vmem:[#allocation5 + $0x2c] sm:$0xf]  ;;  %v1633_v10 = vld [vmem:[#allocation5 + $0x38] sm:$0xf0] }
  0x21   :  { %v1632_v8 = vor.u32 %v2288_v6, %v1631_v5  ;;  %v1607_v11 = vld [vmem:[#allocation5] sm:$0xf]  ;;  %189 = vmatpush.bf16.msra.mxu0 %v1624_v3  ;;  %v1636_v12 = vor.u32 %v2286_v9, %v1633_v10  ;;  %v2283_v13 = vld [vmem:[#allocation5 + $0xc] sm:$0xf0]  ;;  %v2281_v14 = vld [vmem:[#allocation5 + $0x4] sm:$0xf] }
  0x22   :  { %v1609_v15 = vld [vmem:[#allocation5 + $0x10] sm:$0xf0]  ;;  %203 = vmatpush.bf16.msra.mxu1 %v1628_v7  ;;  %v1608_v16 = vor.u32 %v2283_v13, %v1607_v11  ;;  %v1615_v18 = vld [vmem:[#allocation5 + $0x8] sm:$0xf]  ;;  %v2284_v19 = vld [vmem:[#allocation5 + $0x14] sm:$0xf0] }
  0x23   :  { %217 = vmatpush.bf16.msra.mxu2 %v1632_v8  ;;  %v1612_v17 = vor.u32 %v2281_v14, %v1609_v15  ;;  %v2282_v20 = vld [vmem:[#allocation5 + $0xc] sm:$0xf]  ;;  %231 = vmatpush.bf16.msra.mxu3 %v1636_v12  ;;  %v1616_v21 = vor.u32 %v2284_v19, %v1615_v18  ;;  %v1617_v22 = vld [vmem:[#allocation5 + $0x18] sm:$0xf0]  ;;  %v118_v23 = vld [vmem:[#allocation2] sm:$0xff]  ;;  %vm179_vm0 = vcmask 261120  }
  0x24   :  { %v119_v24 = vld [vmem:[#allocation2 + $0x8] sm:$0xff]  ;;  %v1620_v25 = vor.u32 %v2282_v20, %v1617_v22  ;;  %v1755_v27 = vld [vmem:[#allocation8 + $0xe0] sm:$0xf]  ;;  %v2319_v28 = vld [vmem:[#allocation8 + $0xec] sm:$0xf0] }
  0x25   :  { %v120_v26 = vpack.c.bf16 %v119_v24, %v118_v23  ;;  %v1883_v29 = vld [vmem:[#allocation8 + $0x1e0] sm:$0xf]  ;;  %190 = vmatpush.bf16.msra.mxu0 %v1608_v16  ;;  %v1756_v30 = vor.u32 %v2319_v28, %v1755_v27  ;;  %v2351_v31 = vld [vmem:[#allocation8 + $0x1ec] sm:$0xf0] }
  0x26   :  { %v1739_v32 = vld [vmem:[#allocation8 + $0xc0] sm:$0xf]  ;;  %v2315_v33 = vld [vmem:[#allocation8 + $0xcc] sm:$0xf0]  ;;  %204 = vmatpush.bf16.msra.mxu1 %v1612_v17  ;;  %v1884_v34 = vor.u32 %v2351_v31, %v1883_v29 }
  0x27   :  { %218 = vmatpush.bf16.msra.mxu2 %v1616_v21  ;;  %v1867_v35 = vld [vmem:[#allocation8 + $0x1c0] sm:$0xf]  ;;  %v2347_v36 = vld [vmem:[#allocation8 + $0x1cc] sm:$0xf0]  ;;  %232 = vmatpush.bf16.msra.mxu3 %v1620_v25  ;;  %v1740_v38 = vor.u32 %v2315_v33, %v1739_v32 }
  0x28   :  { %v2011_v37 = vld [vmem:[#allocation8 + $0x2e0] sm:$0xf]  ;;  %v2383_v39 = vld [vmem:[#allocation8 + $0x2ec] sm:$0xf0]  ;;  %1637 = vmatmul.msk.bf16.vlgmr.msra.gmra.mxu0 %vm179_vm0, %v120_v26  ;;  %v1868_v42 = vor.u32 %v2347_v36, %v1867_v35 }
  0x29   :  { %1029 = vmatpush.bf16.msrb.mxu0 %v1756_v30  ;;  %v2139_v40 = vld [vmem:[#allocation8 + $0x3e0] sm:$0xf]  ;;  %v2415_v41 = vld [vmem:[#allocation8 + $0x3ec] sm:$0xf0]  ;;  %v2012_v43 = vor.u32 %v2383_v39, %v2011_v37  ;;  %1638 = vmatmul.msk.bf16.vlgmr.msra.gmra.mxu1 %vm179_vm0, %v120_v26 }
  0x2a   :  { %1043 = vmatpush.bf16.msrb.mxu1 %v1884_v34  ;;  %v2140_v44 = vor.u32 %v2415_v41, %v2139_v40  ;;  %v1723_v45 = vld [vmem:[#allocation8 + $0xa0] sm:$0xf]  ;;  %v2311_v46 = vld [vmem:[#allocation8 + $0xac] sm:$0xf0]  ;;  %1639 = vmatmul.msk.bf16.vlgmr.msra.gmra.mxu2 %vm179_vm0, %v120_v26 }
  0x2b   :  { %v1851_v47 = vld [vmem:[#allocation8 + $0x1a0] sm:$0xf]  ;;  %v2343_v48 = vld [vmem:[#allocation8 + $0x1ac] sm:$0xf0]  ;;  %1640 = vmatmul.msk.bf16.vlgmr.msra.gmra.mxu3 %vm179_vm0, %v120_v26  ;;  %1057 = vmatpush.bf16.msrb.mxu2 %v2012_v43  ;;  %v1724_v54 = vor.u32 %v2311_v46, %v1723_v45 }
  0x2c   :  { %v1995_v49 = vld [vmem:[#allocation8 + $0x2c0] sm:$0xf]  ;;  %v2379_v50 = vld [vmem:[#allocation8 + $0x2cc] sm:$0xf0]  ;;  %1071 = vmatpush.bf16.msrb.mxu3 %v2140_v44  ;;  %v1852_v58 = vor.u32 %v2343_v48, %v1851_v47 }
  0x2d   :  { %v1996_v51 = vor.u32 %v2379_v50, %v1995_v49  ;;  %v2123_v52 = vld [vmem:[#allocation8 + $0x3c0] sm:$0xf]  ;;  %v2411_v53 = vld [vmem:[#allocation8 + $0x3cc] sm:$0xf0]  ;;  %1030 = vmatpush.bf16.msrb.mxu0 %v1740_v38  ;;  %v2317_v49 = vld [vmem:[#allocation8 + $0xe4] sm:$0xf] }
  0x2e   :  { %v2124_v55 = vor.u32 %v2411_v53, %v2123_v52  ;;  %v1707_v56 = vld [vmem:[#allocation8 + $0x80] sm:$0xf]  ;;  %v2307_v57 = vld [vmem:[#allocation8 + $0x8c] sm:$0xf0]  ;;  %1044 = vmatpush.bf16.msrb.mxu1 %v1868_v42  ;;  %v1757_v50 = vld [vmem:[#allocation8 + $0xf0] sm:$0xf0] }
  0x2f   :  { %v1979_v59 = vld [vmem:[#allocation8 + $0x2a0] sm:$0xf]  ;;  %v2375_v60 = vld [vmem:[#allocation8 + $0x2ac] sm:$0xf0]  ;;  %1058 = vmatpush.bf16.msrb.mxu2 %v1996_v51  ;;  %v1708_v2 = vor.u32 %v2307_v57, %v1707_v56  ;;  %v2349_v51 = vld [vmem:[#allocation8 + $0x1e4] sm:$0xf] }
  0x30   :  { %v2107_v61 = vld [vmem:[#allocation8 + $0x3a0] sm:$0xf]  ;;  %v2339_v63 = vld [vmem:[#allocation8 + $0x18c] sm:$0xf0]  ;;  %v1980_v1 = vor.u32 %v2375_v60, %v1979_v59  ;;  %1072 = vmatpush.bf16.msrb.mxu3 %v2124_v55  ;;  %v1885_v52 = vld [vmem:[#allocation8 + $0x1f0] sm:$0xf0] }
  0x31   :  { %v1835_v62 = vld [vmem:[#allocation8 + $0x180] sm:$0xf]  ;;  %v2407_v0 = vld [vmem:[#allocation8 + $0x3ac] sm:$0xf0]  ;;  %1031 = vmatpush.bf16.msrb.mxu0 %v1724_v54  ;;  %v2313_v56 = vld [vmem:[#allocation8 + $0xc4] sm:$0xf] }
  0x32   :  { %v2108_v3 = vor.u32 %v2407_v0, %v2107_v61  ;;  %v1691_v4 = vld [vmem:[#allocation8 + $0x60] sm:$0xf]  ;;  %v2371_v6 = vld [vmem:[#allocation8 + $0x28c] sm:$0xf0]  ;;  %1045 = vmatpush.bf16.msrb.mxu1 %v1852_v58  ;;  %v1836_v7 = vor.u32 %v2339_v63, %v1835_v62  ;;  %v1741_v57 = vld [vmem:[#allocation8 + $0xd0] sm:$0xf0]  ;;  %v1760_v62 = vor.u32 %v2317_v49, %v1757_v50 }
  0x33   :  { %v1963_v5 = vld [vmem:[#allocation8 + $0x280] sm:$0xf]  ;;  %v2303_v8 = vld [vmem:[#allocation8 + $0x6c] sm:$0xf0]  ;;  %1059 = vmatpush.bf16.msrb.mxu2 %v1980_v1  ;;  %v2381_v0 = vld [vmem:[#allocation8 + $0x2e4] sm:$0xf] }
  0x34   :  { %v2091_v9 = vld [vmem:[#allocation8 + $0x380] sm:$0xf]  ;;  %v2403_v10 = vld [vmem:[#allocation8 + $0x38c] sm:$0xf0]  ;;  %v1964_v13 = vor.u32 %v2371_v6, %v1963_v5  ;;  %1073 = vmatpush.bf16.msrb.mxu3 %v2108_v3  ;;  %v1692_v14 = vor.u32 %v2303_v8, %v1691_v4  ;;  %v2013_v1 = vld [vmem:[#allocation8 + $0x2f0] sm:$0xf0] }
  0x35   :  { %v1819_v11 = vld [vmem:[#allocation8 + $0x160] sm:$0xf]  ;;  %v2335_v12 = vld [vmem:[#allocation8 + $0x16c] sm:$0xf0]  ;;  %1032 = vmatpush.bf16.msrb.mxu0 %v1708_v2  ;;  %v2092_v15 = vor.u32 %v2403_v10, %v2091_v9  ;;  %v1888_v2 = vor.u32 %v2349_v51, %v1885_v52  ;;  %v2413_v3 = vld [vmem:[#allocation8 + $0x3e4] sm:$0xf]  ;;  %v2016_v9 = vor.u32 %v2381_v0, %v2013_v1  ;;  %v1744_v10 = vor.u32 %v2313_v56, %v1741_v57 }
  0x36   :  { %v1675_v16 = vld [vmem:[#allocation8 + $0x40] sm:$0xf]  ;;  %v2367_v18 = vld [vmem:[#allocation8 + $0x26c] sm:$0xf0]  ;;  %1046 = vmatpush.bf16.msrb.mxu1 %v1836_v7  ;;  %v1820_v19 = vor.u32 %v2335_v12, %v1819_v11  ;;  %v2141_v4 = vld [vmem:[#allocation8 + $0x3f0] sm:$0xf0] }
  0x37   :  { %v1947_v17 = vld [vmem:[#allocation8 + $0x260] sm:$0xf]  ;;  %v2299_v20 = vld [vmem:[#allocation8 + $0x4c] sm:$0xf0]  ;;  %1060 = vmatpush.bf16.msrb.mxu2 %v1964_v13  ;;  %v2345_v5 = vld [vmem:[#allocation8 + $0x1c4] sm:$0xf]  ;;  %v2144_v11 = vor.u32 %v2413_v3, %v2141_v4 }
  0x38   :  { %v2075_v21 = vld [vmem:[#allocation8 + $0x360] sm:$0xf]  ;;  %v2399_v22 = vld [vmem:[#allocation8 + $0x36c] sm:$0xf0]  ;;  %v1948_v25 = vor.u32 %v2367_v18, %v1947_v17  ;;  %1074 = vmatpush.bf16.msrb.mxu3 %v2092_v15  ;;  %v1676_v26 = vor.u32 %v2299_v20, %v1675_v16  ;;  %v1869_v6 = vld [vmem:[#allocation8 + $0x1d0] sm:$0xf0] }
  0x39   :  { %v1803_v23 = vld [vmem:[#allocation8 + $0x140] sm:$0xf]  ;;  %v2331_v24 = vld [vmem:[#allocation8 + $0x14c] sm:$0xf0]  ;;  %1033 = vmatpush.bf16.msrb.mxu0 %v1692_v14  ;;  %v2076_v27 = vor.u32 %v2399_v22, %v2075_v21  ;;  %v2309_v12 = vld [vmem:[#allocation8 + $0xa4] sm:$0xf]  ;;  %v1872_v15 = vor.u32 %v2345_v5, %v1869_v6 }
  0x3a   :  { %v1659_v28 = vld [vmem:[#allocation8 + $0x20] sm:$0xf]  ;;  %v2363_v30 = vld [vmem:[#allocation8 + $0x24c] sm:$0xf0]  ;;  %1047 = vmatpush.bf16.msrb.mxu1 %v1820_v19  ;;  %v1804_v31 = vor.u32 %v2331_v24, %v1803_v23  ;;  %v2377_v13 = vld [vmem:[#allocation8 + $0x2c4] sm:$0xf] }
  0x3b   :  { %v1931_v29 = vld [vmem:[#allocation8 + $0x240] sm:$0xf]  ;;  %v2295_v32 = vld [vmem:[#allocation8 + $0x2c] sm:$0xf0]  ;;  %1061 = vmatpush.bf16.msrb.mxu2 %v1948_v25  ;;  %v1997_v14 = vld [vmem:[#allocation8 + $0x2d0] sm:$0xf0] }
  0x3c   :  { %v2059_v33 = vld [vmem:[#allocation8 + $0x340] sm:$0xf]  ;;  %v2395_v34 = vld [vmem:[#allocation8 + $0x34c] sm:$0xf0]  ;;  %v1932_v37 = vor.u32 %v2363_v30, %v1931_v29  ;;  %1075 = vmatpush.bf16.msrb.mxu3 %v2076_v27  ;;  %v1660_v39 = vor.u32 %v2295_v32, %v1659_v28  ;;  %v1725_v16 = vld [vmem:[#allocation8 + $0xb0] sm:$0xf0]  ;;  %v2000_v21 = vor.u32 %v2377_v13, %v1997_v14 }
  0x3d   :  { %v1787_v35 = vld [vmem:[#allocation8 + $0x120] sm:$0xf]  ;;  %v2327_v36 = vld [vmem:[#allocation8 + $0x12c] sm:$0xf0]  ;;  %1034 = vmatpush.bf16.msrb.mxu0 %v1676_v26  ;;  %v2060_v40 = vor.u32 %v2395_v34, %v2059_v33  ;;  %v2409_v17 = vld [vmem:[#allocation8 + $0x3c4] sm:$0xf]  ;;  %v1728_v22 = vor.u32 %v2309_v12, %v1725_v16 }
  0x3e   :  { %v1643_v38 = vld [vmem:[#allocation8] sm:$0xf]  ;;  %v2291_v41 = vld [vmem:[#allocation8 + $0xc] sm:$0xf0]  ;;  %1048 = vmatpush.bf16.msrb.mxu1 %v1804_v31  ;;  %v1788_v44 = vor.u32 %v2327_v36, %v1787_v35  ;;  %v2125_v18 = vld [vmem:[#allocation8 + $0x3d0] sm:$0xf0] }
  0x3f   :  { %v1915_v42 = vld [vmem:[#allocation8 + $0x220] sm:$0xf]  ;;  %v2359_v43 = vld [vmem:[#allocation8 + $0x22c] sm:$0xf0]  ;;  %1062 = vmatpush.bf16.msrb.mxu2 %v1932_v37  ;;  %v1644_v54 = vor.u32 %v2291_v41, %v1643_v38  ;;  %v2341_v19 = vld [vmem:[#allocation8 + $0x1a4] sm:$0xf]  ;;  %v2128_v23 = vor.u32 %v2409_v17, %v2125_v18 }
  0x40   :  { %v1771_v45 = vld [vmem:[#allocation8 + $0x100] sm:$0xf]  ;;  %v2391_v47 = vld [vmem:[#allocation8 + $0x32c] sm:$0xf0]  ;;  %v1916_v53 = vor.u32 %v2359_v43, %v1915_v42  ;;  %1076 = vmatpush.bf16.msrb.mxu3 %v2060_v40  ;;  %v1853_v20 = vld [vmem:[#allocation8 + $0x1b0] sm:$0xf0] }
  0x41   :  { %v2043_v46 = vld [vmem:[#allocation8 + $0x320] sm:$0xf]  ;;  %v2323_v48 = vld [vmem:[#allocation8 + $0x10c] sm:$0xf0]  ;;  %1035 = vmatpush.bf16.msrb.mxu0 %v1660_v39  ;;  %v1856_v24 = vor.u32 %v2341_v19, %v1853_v20  ;;  %v2305_v25 = vld [vmem:[#allocation8 + $0x84] sm:$0xf] }
  0x42   :  { %v2044_v55 = vor.u32 %v2391_v47, %v2043_v46  ;;  %v1899_v58 = vld [vmem:[#allocation8 + $0x200] sm:$0xf]  ;;  %v2355_v59 = vld [vmem:[#allocation8 + $0x20c] sm:$0xf0]  ;;  %1049 = vmatpush.bf16.msrb.mxu1 %v1788_v44  ;;  %v1772_v61 = vor.u32 %v2323_v48, %v1771_v45  ;;  %v1709_v26 = vld [vmem:[#allocation8 + $0x90] sm:$0xf0] }
  0x43   :  { %v2027_v60 = vld [vmem:[#allocation8 + $0x300] sm:$0xf]  ;;  %v2387_v63 = vld [vmem:[#allocation8 + $0x30c] sm:$0xf0]  ;;  %1063 = vmatpush.bf16.msrb.mxu2 %v1916_v53  ;;  %v1900_v7 = vor.u32 %v2355_v59, %v1899_v58  ;;  %v2337_v27 = vld [vmem:[#allocation8 + $0x184] sm:$0xf]  ;;  %v1712_v29 = vor.u32 %v2305_v25, %v1709_v26 }
  0x44   :  { %1077 = vmatpush.bf16.msrb.mxu3 %v2044_v55  ;;  %v2028_v8 = vor.u32 %v2387_v63, %v2027_v60  ;;  %v1837_v28 = vld [vmem:[#allocation8 + $0x190] sm:$0xf0]  ;;  %v2373_v31 = vld [vmem:[#allocation8 + $0x2a4] sm:$0xf] }
  0x45   :  { %1036 = vmatpush.bf16.msrb.mxu0 %v1644_v54  ;;  %v1840_v30 = vor.u32 %v2337_v27, %v1837_v28  ;;  %v1981_v32 = vld [vmem:[#allocation8 + $0x2b0] sm:$0xf0]  ;;  %v2405_v33 = vld [vmem:[#allocation8 + $0x3a4] sm:$0xf]  ;;  %v129_v27 = vld [vmem:[#allocation7] sm:$0xf] }
  0x46   :  { %1050 = vmatpush.bf16.msrb.mxu1 %v1772_v61  ;;  %v1984_v34 = vor.u32 %v2373_v31, %v1981_v32  ;;  %v2109_v35 = vld [vmem:[#allocation8 + $0x3b0] sm:$0xf0]  ;;  %v2301_v37 = vld [vmem:[#allocation8 + $0x64] sm:$0xf]  ;;  %v132_v31 = vperm.slane %v129_v27, 1 }
  0x47   :  { %1064 = vmatpush.bf16.msrb.mxu2 %v1900_v7  ;;  %v2112_v36 = vor.u32 %v2405_v33, %v2109_v35  ;;  %v1693_v38 = vld [vmem:[#allocation8 + $0x70] sm:$0xf0]  ;;  %v2333_v39 = vld [vmem:[#allocation8 + $0x164] sm:$0xf] }
  0x48   :  { %1078 = vmatpush.bf16.msrb.mxu3 %v2028_v8  ;;  %v1696_v40 = vor.u32 %v2301_v37, %v1693_v38  ;;  %v1821_v41 = vld [vmem:[#allocation8 + $0x170] sm:$0xf0]  ;;  %v2369_v43 = vld [vmem:[#allocation8 + $0x284] sm:$0xf] }
  0x49   :  { %1085 = vmatpush.bf16.msra.mxu0 %v1760_v62  ;;  %v1824_v42 = vor.u32 %v2333_v39, %v1821_v41  ;;  %v1965_v44 = vld [vmem:[#allocation8 + $0x290] sm:$0xf0]  ;;  %v2401_v46 = vld [vmem:[#allocation8 + $0x384] sm:$0xf]  ;;  %v2320_v41 = vld [vmem:[#allocation8 + $0xf4] sm:$0xf0] }
  0x4a   :  { %1099 = vmatpush.bf16.msra.mxu1 %v1888_v2  ;;  %v1968_v45 = vor.u32 %v2369_v43, %v1965_v44  ;;  %v2093_v47 = vld [vmem:[#allocation8 + $0x390] sm:$0xf0]  ;;  %v2297_v49 = vld [vmem:[#allocation8 + $0x44] sm:$0xf]  ;;  %v133_v43 = vperm.slane %v129_v27, 2 }
  0x4b   :  { %1113 = vmatpush.bf16.msra.mxu2 %v2016_v9  ;;  %v2096_v48 = vor.u32 %v2401_v46, %v2093_v47  ;;  %v1677_v50 = vld [vmem:[#allocation8 + $0x50] sm:$0xf0]  ;;  %v2329_v51 = vld [vmem:[#allocation8 + $0x144] sm:$0xf]  ;;  %v2352_v46 = vld [vmem:[#allocation8 + $0x1f4] sm:$0xf0] }
  0x4c   :  { %1127 = vmatpush.bf16.msra.mxu3 %v2144_v11  ;;  %v1680_v52 = vor.u32 %v2297_v49, %v1677_v50  ;;  %v1805_v53 = vld [vmem:[#allocation8 + $0x150] sm:$0xf0]  ;;  %v2365_v55 = vld [vmem:[#allocation8 + $0x264] sm:$0xf]  ;;  %v134_v47 = vperm.slane %v129_v27, 3 }
  0x4d   :  { %1086 = vmatpush.bf16.msra.mxu0 %v1744_v10  ;;  %v1808_v54 = vor.u32 %v2329_v51, %v1805_v53  ;;  %v1949_v56 = vld [vmem:[#allocation8 + $0x270] sm:$0xf0]  ;;  %v2397_v57 = vld [vmem:[#allocation8 + $0x364] sm:$0xf]  ;;  %v1747_v53 = vld [vmem:[#allocation8 + $0xc8] sm:$0xf] }
  0x4e   :  { %1100 = vmatpush.bf16.msra.mxu1 %v1872_v15  ;;  %v1952_v58 = vor.u32 %v2365_v55, %v1949_v56  ;;  %v2077_v59 = vld [vmem:[#allocation8 + $0x370] sm:$0xf0]  ;;  %v2293_v61 = vld [vmem:[#allocation8 + $0x24] sm:$0xf] }
  0x4f   :  { %1114 = vmatpush.bf16.msra.mxu2 %v2000_v21  ;;  %v2080_v60 = vor.u32 %v2397_v57, %v2077_v59  ;;  %v1661_v62 = vld [vmem:[#allocation8 + $0x30] sm:$0xf0]  ;;  %v2325_v0 = vld [vmem:[#allocation8 + $0x124] sm:$0xf]  ;;  %v1875_v57 = vld [vmem:[#allocation8 + $0x1c8] sm:$0xf] }
  0x50   :  { %1128 = vmatpush.bf16.msra.mxu3 %v2128_v23  ;;  %v1664_v63 = vor.u32 %v2293_v61, %v1661_v62  ;;  %v1789_v1 = vld [vmem:[#allocation8 + $0x130] sm:$0xf0]  ;;  %v2361_v3 = vld [vmem:[#allocation8 + $0x244] sm:$0xf] }
  0x51   :  { %1087 = vmatpush.bf16.msra.mxu0 %v1728_v22  ;;  %v1792_v2 = vor.u32 %v2325_v0, %v1789_v1  ;;  %v1933_v4 = vld [vmem:[#allocation8 + $0x250] sm:$0xf0]  ;;  %v2393_v5 = vld [vmem:[#allocation8 + $0x344] sm:$0xf]  ;;  %v2019_v0 = vld [vmem:[#allocation8 + $0x2e8] sm:$0xf] }
  0x52   :  { %1101 = vmatpush.bf16.msra.mxu1 %v1856_v24  ;;  %v1936_v6 = vor.u32 %v2361_v3, %v1933_v4  ;;  %v2061_v7 = vld [vmem:[#allocation8 + $0x350] sm:$0xf0]  ;;  %v2289_v9 = vld [vmem:[#allocation8 + $0x4] sm:$0xf]  ;;  %v2384_v1 = vld [vmem:[#allocation8 + $0x2f4] sm:$0xf0] }
  0x53   :  { %1115 = vmatpush.bf16.msra.mxu2 %v1984_v34  ;;  %v2064_v8 = vor.u32 %v2393_v5, %v2061_v7  ;;  %v1645_v10 = vld [vmem:[#allocation8 + $0x10] sm:$0xf0]  ;;  %v2321_v11 = vld [vmem:[#allocation8 + $0x104] sm:$0xf]  ;;  %v2416_v5 = vld [vmem:[#allocation8 + $0x3f4] sm:$0xf0] }
  0x54   :  { %1129 = vmatpush.bf16.msra.mxu3 %v2112_v36  ;;  %v1648_v12 = vor.u32 %v2289_v9, %v1645_v10  ;;  %v1773_v13 = vld [vmem:[#allocation8 + $0x110] sm:$0xf0]  ;;  %v2357_v15 = vld [vmem:[#allocation8 + $0x224] sm:$0xf]  ;;  %v2312_v7 = vld [vmem:[#allocation8 + $0xb4] sm:$0xf0] }
  0x55   :  { %1088 = vmatpush.bf16.msra.mxu0 %v1712_v29  ;;  %v1776_v14 = vor.u32 %v2321_v11, %v1773_v13  ;;  %v1917_v16 = vld [vmem:[#allocation8 + $0x230] sm:$0xf0]  ;;  %v2389_v17 = vld [vmem:[#allocation8 + $0x324] sm:$0xf]  ;;  %v131_v29 = vperm.slane %v129_v27, 0 }
  0x56   :  { %1102 = vmatpush.bf16.msra.mxu1 %v1840_v30  ;;  %v2045_v18 = vld [vmem:[#allocation8 + $0x330] sm:$0xf0]  ;;  %v1920_v19 = vor.u32 %v2357_v15, %v1917_v16  ;;  %v2353_v21 = vld [vmem:[#allocation8 + $0x204] sm:$0xf]  ;;  %v1859_v10 = vld [vmem:[#allocation8 + $0x1a8] sm:$0xf] }
  0x57   :  { %1116 = vmatpush.bf16.msra.mxu2 %v1968_v45  ;;  %v2048_v20 = vor.u32 %v2389_v17, %v2045_v18  ;;  %v1901_v22 = vld [vmem:[#allocation8 + $0x210] sm:$0xf0]  ;;  %v2385_v24 = vld [vmem:[#allocation8 + $0x304] sm:$0xf]  ;;  %v1891_v45 = vld [vmem:[#allocation8 + $0x1e8] sm:$0xf] }
  0x58   :  { %1130 = vmatpush.bf16.msra.mxu3 %v2096_v48  ;;  %v1904_v23 = vor.u32 %v2353_v21, %v1901_v22  ;;  %v2029_v25 = vld [vmem:[#allocation8 + $0x310] sm:$0xf0]  ;;  %v2344_v11 = vld [vmem:[#allocation8 + $0x1b4] sm:$0xf0]  ;;  %v2003_v18 = vld [vmem:[#allocation8 + $0x2c8] sm:$0xf] }
  0x59   :  { %1089 = vmatpush.bf16.msra.mxu0 %v1696_v40  ;;  %v2032_v26 = vor.u32 %v2385_v24, %v2029_v25  ;;  %v1763_v40 = vld [vmem:[#allocation8 + $0xe8] sm:$0xf]  ;;  %v1860_v22 = vor.u32 %v2344_v11, %v1859_v10  ;;  %v2308_v25 = vld [vmem:[#allocation8 + $0x94] sm:$0xf0] }
  0x5a   :  { %1103 = vmatpush.bf16.msra.mxu1 %v1824_v42  ;;  %v1764_v50 = vor.u32 %v2320_v41, %v1763_v40  ;;  %v1715_v24 = vld [vmem:[#allocation8 + $0x88] sm:$0xf]  ;;  %v2340_v27 = vld [vmem:[#allocation8 + $0x194] sm:$0xf0] }
  0x5b   :  { %1117 = vmatpush.bf16.msra.mxu2 %v1952_v58  ;;  %v2348_v58 = vld [vmem:[#allocation8 + $0x1d4] sm:$0xf0]  ;;  %v1651_v10 = vld [vmem:[#allocation8 + $0x8] sm:$0xf] }
  0x5c   :  { %1131 = vmatpush.bf16.msra.mxu3 %v2080_v60  ;;  %v1876_v4 = vor.u32 %v2348_v58, %v1875_v57  ;;  %v2368_v57 = vld [vmem:[#allocation8 + $0x274] sm:$0xf0] }
  0x5d   :  { %1090 = vmatpush.bf16.msra.mxu0 %v1680_v52  ;;  %v1892_v52 = vor.u32 %v2352_v46, %v1891_v45  ;;  %v2099_v46 = vld [vmem:[#allocation8 + $0x388] sm:$0xf]  ;;  %v2292_v11 = vld [vmem:[#allocation8 + $0x14] sm:$0xf0] }
  0x5e   :  { %1104 = vmatpush.bf16.msra.mxu1 %v1808_v54  ;;  %v2316_v54 = vld [vmem:[#allocation8 + $0xd4] sm:$0xf0] }
  0x5f   :  { %1118 = vmatpush.bf16.msra.mxu2 %v1936_v6  ;;  %v1731_v6 = vld [vmem:[#allocation8 + $0xa8] sm:$0xf] }
  0x60   :  { %1132 = vmatpush.bf16.msra.mxu3 %v2064_v8  ;;  %v1732_v17 = vor.u32 %v2312_v7, %v1731_v6  ;;  %v2067_v6 = vld [vmem:[#allocation8 + $0x348] sm:$0xf] }
  0x61   :  { %1091 = vmatpush.bf16.msra.mxu0 %v1664_v63  ;;  %v1748_v63 = vor.u32 %v2316_v54, %v1747_v53 }
  0x62   :  { %1105 = vmatpush.bf16.msra.mxu1 %v1792_v2  ;;  %v2147_v2 = vld [vmem:[#allocation8 + $0x3e8] sm:$0xf] }
  0x63   :  { %1119 = vmatpush.bf16.msra.mxu2 %v1920_v19  ;;  %v2148_v16 = vor.u32 %v2416_v5, %v2147_v2  ;;  %v2380_v19 = vld [vmem:[#allocation8 + $0x2d4] sm:$0xf0] }
  0x64   :  { %1133 = vmatpush.bf16.msra.mxu3 %v2048_v20  ;;  %v2131_v20 = vld [vmem:[#allocation8 + $0x3c8] sm:$0xf]  ;;  %v2364_v5 = vld [vmem:[#allocation8 + $0x254] sm:$0xf0] }
  0x65   :  { %1092 = vmatpush.bf16.msra.mxu0 %v1648_v12 }
  0x66   :  { %1106 = vmatpush.bf16.msra.mxu1 %v1776_v14  ;;  %v2020_v14 = vor.u32 %v2384_v1, %v2019_v0  ;;  %v1795_v0 = vld [vmem:[#allocation8 + $0x128] sm:$0xf]  ;;  %v2328_v1 = vld [vmem:[#allocation8 + $0x134] sm:$0xf0] }
  0x67   :  { %1120 = vmatpush.bf16.msra.mxu2 %v1904_v23  ;;  %v2412_v23 = vld [vmem:[#allocation8 + $0x3d4] sm:$0xf0] }
  0x68   :  { %1134 = vmatpush.bf16.msra.mxu3 %v2032_v26  ;;  %v1843_v26 = vld [vmem:[#allocation8 + $0x188] sm:$0xf] }
  0xa5   :  { %v192_v28 = vpop.f32.mrf.mxu0 }
  0xa6   :  { %v206_v30 = vpop.f32.mrf.mxu1  ;;  %v193_v32 = vadd.f32 %v192_v28, %v131_v29  ;;  %v2004_v28 = vor.u32 %v2380_v19, %v2003_v18  ;;  %v2350_v18 = vld [vmem:[#allocation8 + $0x1ec] sm:$0xf]  ;;  %v1893_v19 = vld [vmem:[#allocation8 + $0x1f8] sm:$0xf0] }
  0xa7   :  { %v207_v33 = vadd.f32 %v206_v30, %v132_v31  ;;  %v1716_v30 = vor.u32 %v2308_v25, %v1715_v24  ;;  %v1652_v24 = vor.u32 %v2292_v11, %v1651_v10  ;;  %v2302_v10 = vld [vmem:[#allocation8 + $0x6c] sm:$0xf]  ;;  %v1701_v11 = vld [vmem:[#allocation8 + $0x78] sm:$0xf0] }
  0xa8   :  { %v239_v37 = vmax.f32 %v193_v32, 0.0  ;;  %v2376_v32 = vld [vmem:[#allocation8 + $0x2b4] sm:$0xf0] }
  0xa9   :  { %v240_v42 = vmax.f32 %v207_v33, 0.0  ;;  %v1844_v33 = vor.u32 %v2340_v27, %v1843_v26  ;;  %v2051_v26 = vld [vmem:[#allocation8 + $0x328] sm:$0xf]  ;;  %v2392_v27 = vld [vmem:[#allocation8 + $0x334] sm:$0xf0] }
  0xad   :  { %v220_v34 = vpop.f32.mrf.mxu2  ;;  %v194_v36 = vpop.f32.mrf.mxu0 }
  0xae   :  { %v234_v35 = vpop.f32.mrf.mxu3  ;;  %v195_v38 = vadd.f32 %v194_v36, %v131_v29  ;;  %v208_v39 = vpop.f32.mrf.mxu1  ;;  %v221_v55 = vadd.f32 %v220_v34, %v133_v43  ;;  %v2132_v29 = vor.u32 %v2412_v23, %v2131_v20  ;;  %v2115_v34 = vld [vmem:[#allocation8 + $0x3a8] sm:$0xf]  ;;  %v2360_v23 = vld [vmem:[#allocation8 + $0x234] sm:$0xf0] }
  0xaf   :  { %v209_v44 = vadd.f32 %v208_v39, %v132_v31  ;;  %v235_v59 = vadd.f32 %v234_v35, %v134_v47  ;;  %v1987_v31 = vld [vmem:[#allocation8 + $0x2a8] sm:$0xf]  ;;  %v2408_v35 = vld [vmem:[#allocation8 + $0x3b4] sm:$0xf0] }
  0xb0   :  { %v243_v48 = vmax.f32 %v195_v38, 0.0  ;;  %v241_v8 = vmax.f32 %v221_v55, 0.0  ;;  %v1699_v36 = vld [vmem:[#allocation8 + $0x68] sm:$0xf]  ;;  %v2336_v39 = vld [vmem:[#allocation8 + $0x174] sm:$0xf0]  ;;  %v1988_v40 = vor.u32 %v2376_v32, %v1987_v31  ;;  %v2116_v41 = vor.u32 %v2408_v35, %v2115_v34 }
  0xb1   :  { %v244_v49 = vmax.f32 %v209_v44, 0.0  ;;  %v242_v12 = vmax.f32 %v235_v59, 0.0  ;;  %v1827_v38 = vld [vmem:[#allocation8 + $0x168] sm:$0xf]  ;;  %v1749_v32 = vld [vmem:[#allocation8 + $0xd8] sm:$0xf0]  ;;  %v2052_v35 = vor.u32 %v2392_v27, %v2051_v26 }
  0xb2   :  { %v2719_v51 = vpack.c.bf16 %v243_v48, %v239_v37  ;;  %v2304_v37 = vld [vmem:[#allocation8 + $0x74] sm:$0xf0]  ;;  %v1828_v45 = vor.u32 %v2336_v39, %v1827_v38  ;;  %v1683_v48 = vld [vmem:[#allocation8 + $0x48] sm:$0xf]  ;;  %v1877_v34 = vld [vmem:[#allocation8 + $0x1d8] sm:$0xf0] }
  0xb3   :  { %v2721_v56 = vpack.c.bf16 %v244_v49, %v240_v42  ;;  %v1971_v42 = vld [vmem:[#allocation8 + $0x288] sm:$0xf]  ;;  %v1700_v44 = vor.u32 %v2304_v37, %v1699_v36  ;;  %v2300_v49 = vld [vmem:[#allocation8 + $0x54] sm:$0xf0]  ;;  %v2330_v26 = vld [vmem:[#allocation8 + $0x14c] sm:$0xf] }
  0xb4   :  { %1037 = vmatmul.bf16.vlgmr.msrb.gmra.mxu0 %v2719_v51  ;;  %v1955_v55 = vld [vmem:[#allocation8 + $0x268] sm:$0xf]  ;;  %v1684_v58 = vor.u32 %v2300_v49, %v1683_v48  ;;  %v2356_v37 = vld [vmem:[#allocation8 + $0x214] sm:$0xf0]  ;;  %v1733_v48 = vld [vmem:[#allocation8 + $0xb8] sm:$0xf0] }
  0xb5   :  { %v222_v60 = vpop.f32.mrf.mxu2  ;;  %1051 = vmatmul.bf16.vlgmr.msrb.gmra.mxu1 %v2721_v56  ;;  %1141 = vmatpush.bf16.msrb.mxu0 %v1764_v50  ;;  %v1811_v50 = vld [vmem:[#allocation8 + $0x148] sm:$0xf]  ;;  %v1956_v2 = vor.u32 %v2368_v57, %v1955_v55  ;;  %v2388_v39 = vld [vmem:[#allocation8 + $0x314] sm:$0xf0]  ;;  %v2342_v49 = vld [vmem:[#allocation8 + $0x1ac] sm:$0xf] }
  0xb6   :  { %v223_v61 = vadd.f32 %v222_v60, %v133_v43  ;;  %v236_v62 = vpop.f32.mrf.mxu3  ;;  %1155 = vmatpush.bf16.msrb.mxu1 %v1892_v52  ;;  %v2372_v43 = vld [vmem:[#allocation8 + $0x294] sm:$0xf0]  ;;  %v2083_v60 = vld [vmem:[#allocation8 + $0x368] sm:$0xf]  ;;  %v2378_v55 = vld [vmem:[#allocation8 + $0x2cc] sm:$0xf] }
  0xb7   :  { %v237_v3 = vadd.f32 %v236_v62, %v134_v47  ;;  %v2404_v47 = vld [vmem:[#allocation8 + $0x394] sm:$0xf0]  ;;  %v1972_v53 = vor.u32 %v2372_v43, %v1971_v42  ;;  %v1667_v62 = vld [vmem:[#allocation8 + $0x28] sm:$0xf]  ;;  %v2005_v57 = vld [vmem:[#allocation8 + $0x2d8] sm:$0xf0] }
  0xb8   :  { %v245_v9 = vmax.f32 %v223_v61, 0.0  ;;  %v2332_v52 = vld [vmem:[#allocation8 + $0x154] sm:$0xf0]  ;;  %v2100_v54 = vor.u32 %v2404_v47, %v2099_v46  ;;  %v1907_v36 = vld [vmem:[#allocation8 + $0x208] sm:$0xf] }
  0xb9   :  { %v246_v13 = vmax.f32 %v237_v3, 0.0  ;;  %1142 = vmatpush.bf16.msrb.mxu0 %v1748_v63  ;;  %v1812_v59 = vor.u32 %v2332_v52, %v1811_v50  ;;  %v2400_v61 = vld [vmem:[#allocation8 + $0x374] sm:$0xf0]  ;;  %v2035_v38 = vld [vmem:[#allocation8 + $0x308] sm:$0xf]  ;;  %v1908_v47 = vor.u32 %v2356_v37, %v1907_v36 }
  0xba   :  { %v2725_v15 = vpack.c.bf16 %v245_v9, %v241_v8  ;;  %1156 = vmatpush.bf16.msrb.mxu1 %v1876_v4  ;;  %v2296_v63 = vld [vmem:[#allocation8 + $0x34] sm:$0xf0]  ;;  %v2084_v3 = vor.u32 %v2400_v61, %v2083_v60  ;;  %v1939_v4 = vld [vmem:[#allocation8 + $0x248] sm:$0xf]  ;;  %v1796_v8 = vor.u32 %v2328_v1, %v1795_v0  ;;  %v2310_v46 = vld [vmem:[#allocation8 + $0xac] sm:$0xf]  ;;  %v2036_v52 = vor.u32 %v2388_v39, %v2035_v38 }
  0xbb   :  { %v2727_v21 = vpack.c.bf16 %v246_v13, %v242_v12  ;;  %v1668_v7 = vor.u32 %v2296_v63, %v1667_v62  ;;  %v2396_v9 = vld [vmem:[#allocation8 + $0x354] sm:$0xf0]  ;;  %v1779_v12 = vld [vmem:[#allocation8 + $0x108] sm:$0xf]  ;;  %v1861_v50 = vld [vmem:[#allocation8 + $0x1b8] sm:$0xf0] }
  0xbc   :  { %1065 = vmatmul.bf16.vlgmr.msrb.gmra.mxu2 %v2725_v15  ;;  %v2324_v13 = vld [vmem:[#allocation8 + $0x114] sm:$0xf0]  ;;  %v2068_v20 = vor.u32 %v2396_v9, %v2067_v6  ;;  %v2410_v60 = vld [vmem:[#allocation8 + $0x3cc] sm:$0xf]  ;;  %v2133_v61 = vld [vmem:[#allocation8 + $0x3d8] sm:$0xf0] }
  0xbd   :  { %1079 = vmatmul.bf16.vlgmr.msrb.gmra.mxu3 %v2727_v21  ;;  %1169 = vmatpush.bf16.msrb.mxu2 %v2020_v14  ;;  %v2318_v14 = vld [vmem:[#allocation8 + $0xec] sm:$0xf]  ;;  %v1780_v25 = vor.u32 %v2324_v13, %v1779_v12  ;;  %v1717_v63 = vld [vmem:[#allocation8 + $0x98] sm:$0xf0] }
  0xbe   :  { %1183 = vmatpush.bf16.msrb.mxu3 %v2148_v16  ;;  %1143 = vmatpush.bf16.msrb.mxu0 %v1732_v17  ;;  %v1940_v16 = vor.u32 %v2364_v5, %v1939_v4  ;;  %v1765_v17 = vld [vmem:[#allocation8 + $0xf8] sm:$0xf0]  ;;  %v2306_v62 = vld [vmem:[#allocation8 + $0x8c] sm:$0xf] }
  0xbf   :  { %1157 = vmatpush.bf16.msrb.mxu1 %v1860_v22  ;;  %v1923_v22 = vld [vmem:[#allocation8 + $0x228] sm:$0xf]  ;;  %v2338_v0 = vld [vmem:[#allocation8 + $0x18c] sm:$0xf]  ;;  %v1845_v1 = vld [vmem:[#allocation8 + $0x198] sm:$0xf0]  ;;  %v1720_v6 = vor.u32 %v2306_v62, %v1717_v63 }
  0xc0   :  { %v1924_v31 = vor.u32 %v2360_v23, %v1923_v22  ;;  %v2374_v4 = vld [vmem:[#allocation8 + $0x2ac] sm:$0xf]  ;;  %v1989_v5 = vld [vmem:[#allocation8 + $0x2b8] sm:$0xf0] }
  0xc1   :  { %1170 = vmatpush.bf16.msrb.mxu2 %v2004_v28  ;;  %v1768_v28 = vor.u32 %v2318_v14, %v1765_v17  ;;  %v2117_v9 = vld [vmem:[#allocation8 + $0x3b8] sm:$0xf0]  ;;  %v2334_v12 = vld [vmem:[#allocation8 + $0x16c] sm:$0xf]  ;;  %v1992_v14 = vor.u32 %v2374_v4, %v1989_v5 }
  0xc2   :  { %1184 = vmatpush.bf16.msrb.mxu3 %v2132_v29  ;;  %1144 = vmatpush.bf16.msrb.mxu0 %v1716_v30  ;;  %v1896_v29 = vor.u32 %v2350_v18, %v1893_v19  ;;  %v2314_v30 = vld [vmem:[#allocation8 + $0xcc] sm:$0xf]  ;;  %v1829_v13 = vld [vmem:[#allocation8 + $0x178] sm:$0xf0]  ;;  %v1704_v19 = vor.u32 %v2302_v10, %v1701_v11 }
  0xc3   :  { %1158 = vmatpush.bf16.msrb.mxu1 %v1844_v33  ;;  %v2346_v33 = vld [vmem:[#allocation8 + $0x1cc] sm:$0xf]  ;;  %v1752_v42 = vor.u32 %v2314_v30, %v1749_v32  ;;  %v1973_v18 = vld [vmem:[#allocation8 + $0x298] sm:$0xf0] }
  0xc4   :  { %1093 = vmatmul.bf16.vlgmr.msra.gmra.mxu0 %v2719_v51  ;;  %v1880_v43 = vor.u32 %v2346_v33, %v1877_v34  ;;  %v2370_v17 = vld [vmem:[#allocation8 + $0x28c] sm:$0xf]  ;;  %v2101_v23 = vld [vmem:[#allocation8 + $0x398] sm:$0xf0] }
  0xc5   :  { %1171 = vmatpush.bf16.msrb.mxu2 %v1988_v40  ;;  %1107 = vmatmul.bf16.vlgmr.msra.gmra.mxu1 %v2721_v56  ;;  %v2382_v40 = vld [vmem:[#allocation8 + $0x2ec] sm:$0xf]  ;;  %v1813_v27 = vld [vmem:[#allocation8 + $0x158] sm:$0xf0] }
  0xc6   :  { %1185 = vmatpush.bf16.msrb.mxu3 %v2116_v41  ;;  %1145 = vmatpush.bf16.msrb.mxu0 %v1700_v44  ;;  %v2021_v41 = vld [vmem:[#allocation8 + $0x2f8] sm:$0xf0]  ;;  %v2414_v44 = vld [vmem:[#allocation8 + $0x3ec] sm:$0xf]  ;;  %v1816_v33 = vor.u32 %v2330_v26, %v1813_v27  ;;  %v2425_v27 = vld [vmem:[#allocation11 + $0x40] sm:$0xff] }
  0xc7   :  { %1159 = vmatpush.bf16.msrb.mxu1 %v1828_v45  ;;  %v2149_v45 = vld [vmem:[#allocation8 + $0x3f8] sm:$0xf0]  ;;  %v2402_v22 = vld [vmem:[#allocation8 + $0x38c] sm:$0xf] }
  0xc8   :  { %v2366_v30 = vld [vmem:[#allocation8 + $0x26c] sm:$0xf]  ;;  %v1669_v37 = vld [vmem:[#allocation8 + $0x38] sm:$0xf0] }
  0xc9   :  { %1172 = vmatpush.bf16.msrb.mxu2 %v1972_v53  ;;  %v2024_v53 = vor.u32 %v2382_v40, %v2021_v41  ;;  %v2398_v34 = vld [vmem:[#allocation8 + $0x36c] sm:$0xf]  ;;  %v1797_v39 = vld [vmem:[#allocation8 + $0x138] sm:$0xf0] }
  0xca   :  { %1186 = vmatpush.bf16.msrb.mxu3 %v2100_v54  ;;  %1146 = vmatpush.bf16.msrb.mxu0 %v1684_v58  ;;  %v2152_v54 = vor.u32 %v2414_v44, %v2149_v45  ;;  %v1736_v58 = vor.u32 %v2310_v46, %v1733_v48  ;;  %v2294_v36 = vld [vmem:[#allocation8 + $0x2c] sm:$0xf]  ;;  %v2424_v62 = vld [vmem:[#allocation11 + $0x38] sm:$0xff] }
  0xcb   :  { %1160 = vmatpush.bf16.msrb.mxu1 %v1812_v59  ;;  %v1864_v59 = vor.u32 %v2342_v49, %v1861_v50  ;;  %v2326_v38 = vld [vmem:[#allocation8 + $0x12c] sm:$0xf]  ;;  %v1672_v44 = vor.u32 %v2294_v36, %v1669_v37  ;;  %v1653_v49 = vld [vmem:[#allocation8 + $0x18] sm:$0xf0] }
  0xcc   :  { %1121 = vmatmul.bf16.vlgmr.msra.gmra.mxu2 %v2725_v15  ;;  %v1800_v45 = vor.u32 %v2326_v38, %v1797_v39  ;;  %v2394_v46 = vld [vmem:[#allocation8 + $0x34c] sm:$0xf]  ;;  %v2037_v4 = vld [vmem:[#allocation8 + $0x318] sm:$0xf0]  ;;  %v2435_v38 = vld [vmem:[#allocation11 + $0x90] sm:$0xff] }
  0xcd   :  { %1135 = vmatmul.bf16.vlgmr.msra.gmra.mxu3 %v2727_v21  ;;  %1173 = vmatpush.bf16.msrb.mxu2 %v1956_v2  ;;  %v2008_v2 = vor.u32 %v2378_v55, %v2005_v57  ;;  %v2290_v48 = vld [vmem:[#allocation8 + $0xc] sm:$0xf]  ;;  %v1925_v57 = vld [vmem:[#allocation8 + $0x238] sm:$0xf0] }
  0xce   :  { %1187 = vmatpush.bf16.msrb.mxu3 %v2084_v3  ;;  %1147 = vmatpush.bf16.msrb.mxu0 %v1668_v7  ;;  %v2136_v3 = vor.u32 %v2410_v60, %v2133_v61  ;;  %v1848_v7 = vor.u32 %v2338_v0, %v1845_v1  ;;  %v2322_v50 = vld [vmem:[#allocation8 + $0x10c] sm:$0xf]  ;;  %v2053_v61 = vld [vmem:[#allocation8 + $0x338] sm:$0xf0] }
  0xcf   :  { %1161 = vmatpush.bf16.msrb.mxu1 %v1796_v8  ;;  %v2406_v8 = vld [vmem:[#allocation8 + $0x3ac] sm:$0xf]  ;;  %v2420_v10 = vld [vmem:[#allocation11 + $0x18] sm:$0xff] }
  0xd0   :  { %v2358_v55 = vld [vmem:[#allocation8 + $0x22c] sm:$0xf]  ;;  %v2432_v11 = vld [vmem:[#allocation11 + $0x78] sm:$0xff] }
  0xd1   :  { %1174 = vmatpush.bf16.msrb.mxu2 %v1940_v16  ;;  %v2120_v16 = vor.u32 %v2406_v8, %v2117_v9  ;;  %v2390_v60 = vld [vmem:[#allocation8 + $0x32c] sm:$0xf]  ;;  %v1928_v63 = vor.u32 %v2358_v55, %v1925_v57  ;;  %v2421_v9 = vld [vmem:[#allocation11 + $0x20] sm:$0xff] }
  0xd2   :  { %1188 = vmatpush.bf16.msrb.mxu3 %v2068_v20  ;;  %1148 = vmatpush.bf16.msrb.mxu0 %v1652_v24  ;;  %v1832_v20 = vor.u32 %v2334_v12, %v1829_v13  ;;  %v2298_v24 = vld [vmem:[#allocation8 + $0x4c] sm:$0xf]  ;;  %v2056_v0 = vor.u32 %v2390_v60, %v2053_v61  ;;  %v2431_v12 = vld [vmem:[#allocation11 + $0x70] sm:$0xff] }
  0xd3   :  { %1162 = vmatpush.bf16.msrb.mxu1 %v1780_v25  ;;  %v1685_v25 = vld [vmem:[#allocation8 + $0x58] sm:$0xf0]  ;;  %v2354_v1 = vld [vmem:[#allocation8 + $0x20c] sm:$0xf] }
  0xd4   :  { %v1688_v32 = vor.u32 %v2298_v24, %v1685_v25  ;;  %v2422_v8 = vld [vmem:[#allocation11 + $0x28] sm:$0xff] }
  0xd5   :  { %1175 = vmatpush.bf16.msrb.mxu2 %v1924_v31  ;;  %1149 = vmatmul.bf16.vlgmr.msrb.gmra.mxu0 %v2719_v51  ;;  %v1957_v31 = vld [vmem:[#allocation8 + $0x278] sm:$0xf0]  ;;  %v2430_v13 = vld [vmem:[#allocation11 + $0x68] sm:$0xff] }
  0xd6   :  { %1197 = vmatpush.bf16.msra.mxu0 %v1768_v28  ;;  %1189 = vmatpush.bf16.msrb.mxu3 %v2052_v35  ;;  %v1976_v28 = vor.u32 %v2370_v17, %v1973_v18  ;;  %v2085_v35 = vld [vmem:[#allocation8 + $0x378] sm:$0xf0]  ;;  %v1960_v40 = vor.u32 %v2366_v30, %v1957_v31  ;;  %v2438_v24 = vld [vmem:[#allocation11 + $0xa8] sm:$0xff] }
  0xd7   :  { %1211 = vmatpush.bf16.msra.mxu1 %v1896_v29  ;;  %v2104_v29 = vor.u32 %v2402_v22, %v2101_v23  ;;  %v2088_v41 = vor.u32 %v2398_v34, %v2085_v35  ;;  %v2743_v22 = vld [vmem:[#allocation10] sm:$0xf]  ;;  %v2426_v23 = vld [vmem:[#allocation11 + $0x48] sm:$0xff] }
  0xd8   :  { %1163 = vmatmul.bf16.vlgmr.msrb.gmra.mxu1 %v2721_v56  ;;  %v381_v25 = vperm.slane %v2743_v22, 0 }
  0xd9   :  { %1176 = vmatpush.bf16.msrb.mxu2 %v1908_v47  ;;  %v2069_v47 = vld [vmem:[#allocation8 + $0x358] sm:$0xf0] }
  0xda   :  { %1198 = vmatpush.bf16.msra.mxu0 %v1752_v42  ;;  %1190 = vmatpush.bf16.msrb.mxu3 %v2036_v52  ;;  %v2362_v42 = vld [vmem:[#allocation8 + $0x24c] sm:$0xf]  ;;  %v1781_v52 = vld [vmem:[#allocation8 + $0x118] sm:$0xf0] }
  0xdb   :  { %1212 = vmatpush.bf16.msra.mxu1 %v1880_v43  ;;  %v1941_v43 = vld [vmem:[#allocation8 + $0x258] sm:$0xf0] }
  0xdc   :  { %1177 = vmatmul.bf16.vlgmr.msrb.gmra.mxu2 %v2725_v15 }
  0xdd   :  { %1225 = vmatpush.bf16.msra.mxu2 %v2024_v53  ;;  %1191 = vmatmul.bf16.vlgmr.msrb.gmra.mxu3 %v2727_v21  ;;  %v1944_v53 = vor.u32 %v2362_v42, %v1941_v43 }
  0xde   :  { %1239 = vmatpush.bf16.msra.mxu3 %v2152_v54  ;;  %1199 = vmatpush.bf16.msra.mxu0 %v1736_v58  ;;  %v2072_v54 = vor.u32 %v2394_v46, %v2069_v47  ;;  %v1656_v58 = vor.u32 %v2290_v48, %v1653_v49  ;;  %v382_v46 = vperm.slane %v2743_v22, 1 }
  0xdf   :  { %1213 = vmatpush.bf16.msra.mxu1 %v1864_v59  ;;  %v1784_v59 = vor.u32 %v2322_v50, %v1781_v52  ;;  %v2433_v52 = vld [vmem:[#allocation11 + $0x80] sm:$0xff] }
  0xe1   :  { %1226 = vmatpush.bf16.msra.mxu2 %v2008_v2  ;;  %v1909_v2 = vld [vmem:[#allocation8 + $0x218] sm:$0xf0] }
  0xe2   :  { %1240 = vmatpush.bf16.msra.mxu3 %v2136_v3  ;;  %1200 = vmatpush.bf16.msra.mxu0 %v1720_v6  ;;  %v2386_v3 = vld [vmem:[#allocation8 + $0x30c] sm:$0xf]  ;;  %v1912_v5 = vor.u32 %v2354_v1, %v1909_v2 }
  0xe3   :  { %1214 = vmatpush.bf16.msra.mxu1 %v1848_v7  ;;  %v2040_v6 = vor.u32 %v2386_v3, %v2037_v4  ;;  %v2423_v7 = vld [vmem:[#allocation11 + $0x30] sm:$0xff] }
  0xe5   :  { %1227 = vmatpush.bf16.msra.mxu2 %v1992_v14  ;;  %v2428_v14 = vld [vmem:[#allocation11 + $0x58] sm:$0xff] }
  0xe6   :  { %1241 = vmatpush.bf16.msra.mxu3 %v2120_v16  ;;  %1201 = vmatpush.bf16.msra.mxu0 %v1704_v19  ;;  %v2440_v16 = vld [vmem:[#allocation11 + $0xb8] sm:$0xff]  ;;  %v2427_v19 = vld [vmem:[#allocation11 + $0x50] sm:$0xff] }
  0xe7   :  { %1215 = vmatpush.bf16.msra.mxu1 %v1832_v20  ;;  %v2439_v20 = vld [vmem:[#allocation11 + $0xb0] sm:$0xff] }
  0xe9   :  { %1228 = vmatpush.bf16.msra.mxu2 %v1976_v28  ;;  %v2437_v28 = vld [vmem:[#allocation11 + $0xa0] sm:$0xff] }
  0xea   :  { %1242 = vmatpush.bf16.msra.mxu3 %v2104_v29  ;;  %1202 = vmatpush.bf16.msra.mxu0 %v1688_v32 }
  0xeb   :  { %1216 = vmatpush.bf16.msra.mxu1 %v1816_v33  ;;  %v2436_v33 = vld [vmem:[#allocation11 + $0x98] sm:$0xff] }
  0xed   :  { %1229 = vmatpush.bf16.msra.mxu2 %v1960_v40 }
  0xee   :  { %1243 = vmatpush.bf16.msra.mxu3 %v2088_v41  ;;  %1203 = vmatpush.bf16.msra.mxu0 %v1672_v44 }
  0xef   :  { %1217 = vmatpush.bf16.msra.mxu1 %v1800_v45  ;;  %v2434_v45 = vld [vmem:[#allocation11 + $0x88] sm:$0xff] }
  0xf1   :  { %1230 = vmatpush.bf16.msra.mxu2 %v1944_v53  ;;  %v2448_v53 = vld [vmem:[#allocation11 + $0xf8] sm:$0xff] }
  0xf2   :  { %1244 = vmatpush.bf16.msra.mxu3 %v2072_v54  ;;  %1204 = vmatpush.bf16.msra.mxu0 %v1656_v58 }
  0xf3   :  { %1218 = vmatpush.bf16.msra.mxu1 %v1784_v59  ;;  %v2447_v59 = vld [vmem:[#allocation11 + $0xf0] sm:$0xff] }
  0xf5   :  { %1231 = vmatpush.bf16.msra.mxu2 %v1928_v63  ;;  %1205 = vmatmul.bf16.vlgmr.msra.gmra.mxu0 %v2719_v51  ;;  %v2419_v51 = vld [vmem:[#allocation11 + $0x10] sm:$0xff]  ;;  %v2446_v63 = vld [vmem:[#allocation11 + $0xe8] sm:$0xff] }
  0xf6   :  { %1525 = vmatpush.bf16.msrb.mxu0 %v2424_v62  ;;  %1245 = vmatpush.bf16.msra.mxu3 %v2056_v0 }
  0xf7   :  { %1219 = vmatmul.bf16.vlgmr.msra.gmra.mxu1 %v2721_v56  ;;  %v2418_v56 = vld [vmem:[#allocation11 + $0x8] sm:$0xff] }
  0xf8   :  { %1539 = vmatpush.bf16.msrb.mxu1 %v2432_v11 }
  0xf9   :  { %1232 = vmatpush.bf16.msra.mxu2 %v1912_v5 }
  0xfa   :  { %1246 = vmatpush.bf16.msra.mxu3 %v2040_v6  ;;  %1526 = vmatpush.bf16.msrb.mxu0 %v2423_v7  ;;  %v2445_v7 = vld [vmem:[#allocation11 + $0xe0] sm:$0xff] }
  0xfc   :  { %1233 = vmatmul.bf16.vlgmr.msra.gmra.mxu2 %v2725_v15  ;;  %1540 = vmatpush.bf16.msrb.mxu1 %v2431_v12  ;;  %v2417_v15 = vld [vmem:[#allocation11] sm:$0xff]  ;;  %v2444_v12 = vld [vmem:[#allocation11 + $0xd8] sm:$0xff] }
  0xfd   :  { %1247 = vmatmul.bf16.vlgmr.msra.gmra.mxu3 %v2727_v21  ;;  %v2429_v21 = vld [vmem:[#allocation11 + $0x60] sm:$0xff]  ;;  %1553 = vmatpush.bf16.msrb.mxu2 %v2440_v16  ;;  %v2443_v16 = vld [vmem:[#allocation11 + $0xd0] sm:$0xff] }
  0xfe   :  { %1527 = vmatpush.bf16.msrb.mxu0 %v2422_v8  ;;  %1567 = vmatpush.bf16.msrb.mxu3 %v2448_v53 }
 0x100   :  { %1541 = vmatpush.bf16.msrb.mxu1 %v2430_v13 }
 0x101   :  { %1554 = vmatpush.bf16.msrb.mxu2 %v2439_v20  ;;  %v2442_v20 = vld [vmem:[#allocation11 + $0xc8] sm:$0xff] }
 0x102   :  { %1528 = vmatpush.bf16.msrb.mxu0 %v2421_v9  ;;  %1568 = vmatpush.bf16.msrb.mxu3 %v2447_v59  ;;  %v383_v9 = vperm.slane %v2743_v22, 2 }
 0x104   :  { %1542 = vmatpush.bf16.msrb.mxu1 %v2429_v21 }
 0x105   :  { %1555 = vmatpush.bf16.msrb.mxu2 %v2438_v24 }
 0x106   :  { %1529 = vmatpush.bf16.msrb.mxu0 %v2420_v10  ;;  %1569 = vmatpush.bf16.msrb.mxu3 %v2446_v63 }
 0x108   :  { %1543 = vmatpush.bf16.msrb.mxu1 %v2428_v14 }
 0x109   :  { %1556 = vmatpush.bf16.msrb.mxu2 %v2437_v28  ;;  %v2441_v28 = vld [vmem:[#allocation11 + $0xc0] sm:$0xff] }
 0x10a   :  { %1530 = vmatpush.bf16.msrb.mxu0 %v2419_v51  ;;  %1570 = vmatpush.bf16.msrb.mxu3 %v2445_v7 }
 0x10c   :  { %1544 = vmatpush.bf16.msrb.mxu1 %v2427_v19 }
 0x10d   :  { %1557 = vmatpush.bf16.msrb.mxu2 %v2436_v33 }
 0x10e   :  { %1531 = vmatpush.bf16.msrb.mxu0 %v2418_v56  ;;  %1571 = vmatpush.bf16.msrb.mxu3 %v2444_v12 }
 0x110   :  { %1545 = vmatpush.bf16.msrb.mxu1 %v2426_v23 }
 0x111   :  { %1558 = vmatpush.bf16.msrb.mxu2 %v2435_v38 }
 0x112   :  { %1532 = vmatpush.bf16.msrb.mxu0 %v2417_v15  ;;  %1572 = vmatpush.bf16.msrb.mxu3 %v2443_v16 }
 0x114   :  { %1546 = vmatpush.bf16.msrb.mxu1 %v2425_v27 }
 0x115   :  { %1559 = vmatpush.bf16.msrb.mxu2 %v2434_v45 }
 0x116   :  { %1573 = vmatpush.bf16.msrb.mxu3 %v2442_v20 }
 0x119   :  { %1560 = vmatpush.bf16.msrb.mxu2 %v2433_v52 }
 0x11a   :  { %1574 = vmatpush.bf16.msrb.mxu3 %v2441_v28 }
 0x131   :  { %v1038_v17 = vpop.f32.mrf.mxu0 }
 0x132   :  { %v1052_v18 = vpop.f32.mrf.mxu1  ;;  %v1039_v29 = vadd.f32 %v1038_v17, %v381_v25 }
 0x134   :  { %v1053_v34 = vadd.f32 %v1052_v18, %v1039_v29 }
 0x139   :  { %v1040_v26 = vpop.f32.mrf.mxu0 }
 0x13a   :  { %v1054_v30 = vpop.f32.mrf.mxu1  ;;  %v1041_v35 = vadd.f32 %v1040_v26, %v381_v25 }
 0x13c   :  { %v1055_v39 = vadd.f32 %v1054_v30, %v1041_v35  ;;  %v384_v35 = vperm.slane %v2743_v22, 3 }
 0x13f   :  { %v1066_v31 = vpop.f32.mrf.mxu2 }
 0x140   :  { %v1080_v32 = vpop.f32.mrf.mxu3  ;;  %v1067_v37 = vadd.f32 %v1066_v31, %v1053_v34 }
 0x141   :  { %v1094_v36 = vpop.f32.mrf.mxu0 }
 0x142   :  { %v1081_v41 = vadd.f32 %v1080_v32, %v1067_v37  ;;  %v1108_v42 = vpop.f32.mrf.mxu1  ;;  %v1095_v54 = vadd.f32 %v1094_v36, %v382_v46 }
 0x144   :  { %v1253_v49 = vmax.f32 %v1081_v41, 0.0  ;;  %v1109_v60 = vadd.f32 %v1108_v42, %v1095_v54 }
 0x147   :  { %v1068_v40 = vpop.f32.mrf.mxu2 }
 0x148   :  { %v1069_v43 = vadd.f32 %v1068_v40, %v1055_v39  ;;  %v1082_v44 = vpop.f32.mrf.mxu3 }
 0x149   :  { %v1096_v48 = vpop.f32.mrf.mxu0 }
 0x14a   :  { %v1083_v47 = vadd.f32 %v1082_v44, %v1069_v43  ;;  %v1097_v61 = vadd.f32 %v1096_v48, %v382_v46  ;;  %v1110_v62 = vpop.f32.mrf.mxu1 }
 0x14c   :  { %v1257_v50 = vmax.f32 %v1083_v47, 0.0  ;;  %v1111_v2 = vadd.f32 %v1110_v62, %v1097_v61 }
 0x14e   :  { %v1261_v55 = vpack.c.bf16 %v1257_v50, %v1253_v49 }
 0x14f   :  { %v1122_v57 = vpop.f32.mrf.mxu2 }
 0x150   :  { %v1136_v58 = vpop.f32.mrf.mxu3  ;;  %1533 = vmatmul.bf16.vlgmr.msrb.gmra.mxu0 %v1261_v55  ;;  %v1123_v0 = vadd.f32 %v1122_v57, %v1109_v60  ;;  %v2462_v55 = vld [vmem:[%s2764_s6] ss:$0 sm:$0xff] }
 0x152   :  { %v1150_v1 = vpop.f32.mrf.mxu0  ;;  %v1137_v4 = vadd.f32 %v1136_v58, %v1123_v0 }
 0x153   :  { %v1151_v13 = vadd.f32 %v1150_v1, %v383_v9 }
 0x154   :  { %v1254_v10 = vmax.f32 %v1137_v4, 0.0 }
 0x155   :  { %v1164_v11 = vpop.f32.mrf.mxu1 }
 0x156   :  { %v1165_v17 = vadd.f32 %v1164_v11, %v1151_v13 }
 0x157   :  { %v1124_v3 = vpop.f32.mrf.mxu2 }
 0x158   :  { %v1125_v5 = vadd.f32 %v1124_v3, %v1111_v2  ;;  %v1138_v6 = vpop.f32.mrf.mxu3 }
 0x15a   :  { %v1139_v8 = vadd.f32 %v1138_v6, %v1125_v5  ;;  %v1152_v15 = vpop.f32.mrf.mxu0 }
 0x15b   :  { %v1153_v18 = vadd.f32 %v1152_v15, %v383_v9 }
 0x15c   :  { %v1258_v51 = vmax.f32 %v1139_v8, 0.0 }
 0x15d   :  { %v1166_v23 = vpop.f32.mrf.mxu1 }
 0x15e   :  { %v1262_v56 = vpack.c.bf16 %v1258_v51, %v1254_v10  ;;  %v1167_v24 = vadd.f32 %v1166_v23, %v1153_v18 }
 0x15f   :  { %v1178_v21 = vpop.f32.mrf.mxu2 }
 0x160   :  { %v1192_v14 = vpop.f32.mrf.mxu3  ;;  %1547 = vmatmul.bf16.vlgmr.msrb.gmra.mxu1 %v1262_v56  ;;  %v1179_v19 = vadd.f32 %v1178_v21, %v1165_v17 }
 0x162   :  { %v1193_v26 = vadd.f32 %v1192_v14, %v1179_v19 }
 0x164   :  { %v1255_v31 = vmax.f32 %v1193_v26, 0.0 }
 0x167   :  { %v1180_v25 = vpop.f32.mrf.mxu2 }
 0x168   :  { %v1181_v27 = vadd.f32 %v1180_v25, %v1167_v24  ;;  %v1194_v29 = vpop.f32.mrf.mxu3 }
 0x16a   :  { %v1195_v30 = vadd.f32 %v1194_v29, %v1181_v27 }
 0x16c   :  { %v1259_v32 = vmax.f32 %v1195_v30, 0.0 }
 0x16e   :  { %v1263_v33 = vpack.c.bf16 %v1259_v32, %v1255_v31 }
 0x170   :  { %1561 = vmatmul.bf16.vlgmr.msrb.gmra.mxu2 %v1263_v33 }
 0x172   :  { %v1206_v34 = vpop.f32.mrf.mxu0 }
 0x173   :  { %v1207_v37 = vadd.f32 %v1206_v34, %v384_v35 }
 0x174   :  { %v1220_v36 = vpop.f32.mrf.mxu1 }
 0x175   :  { %v1221_v41 = vadd.f32 %v1220_v36, %v1207_v37 }
 0x17a   :  { %v1208_v38 = vpop.f32.mrf.mxu0 }
 0x17b   :  { %v1209_v42 = vadd.f32 %v1208_v38, %v384_v35 }
 0x17c   :  { %v1222_v44 = vpop.f32.mrf.mxu1 }
 0x17d   :  { %v1223_v45 = vadd.f32 %v1222_v44, %v1209_v42 }
 0x17f   :  { %v1234_v39 = vpop.f32.mrf.mxu2 }
 0x180   :  { %v1248_v40 = vpop.f32.mrf.mxu3  ;;  %v1235_v43 = vadd.f32 %v1234_v39, %v1221_v41 }
 0x182   :  { %v1249_v47 = vadd.f32 %v1248_v40, %v1235_v43 }
 0x184   :  { %v1256_v52 = vmax.f32 %v1249_v47, 0.0 }
 0x187   :  { %v1236_v46 = vpop.f32.mrf.mxu2 }
 0x188   :  { %v1237_v48 = vadd.f32 %v1236_v46, %v1223_v45  ;;  %v1250_v49 = vpop.f32.mrf.mxu3 }
 0x18a   :  { %v1251_v50 = vadd.f32 %v1250_v49, %v1237_v48 }
 0x18c   :  { %v1260_v53 = vmax.f32 %v1251_v50, 0.0 }
 0x18e   :  { %v1264_v54 = vpack.c.bf16 %v1260_v53, %v1256_v52 }
 0x190   :  { %1575 = vmatmul.bf16.vlgmr.msrb.gmra.mxu3 %v1264_v54 }
 0x1cd   :  { %v1534_v22 = vpop.f32.mrf.mxu0 }
 0x1ce   :  { %v1535_v59 = vadd.f32 %v2462_v55, %v1534_v22 }
 0x1d5   :  { %v1536_v62 = vpop.f32.mrf.mxu0 }
 0x1d6   :  { %v1537_v2 = vadd.f32 %v2462_v55, %v1536_v62 }
 0x1dd   :  { %v1548_v57 = vpop.f32.mrf.mxu1 }
 0x1de   :  { %v1549_v60 = vadd.f32 %v1548_v57, %v1535_v59 }
 0x1e5   :  { %v1550_v1 = vpop.f32.mrf.mxu1 }
 0x1e6   :  { %v1551_v4 = vadd.f32 %v1550_v1, %v1537_v2 }
 0x1f3   :  { %v1562_v58 = vpop.f32.mrf.mxu2 }
 0x1f4   :  { %v1563_v61 = vadd.f32 %v1562_v58, %v1549_v60 }
 0x1fb   :  { %v1564_v3 = vpop.f32.mrf.mxu2 }
 0x1fc   :  { %v1565_v5 = vadd.f32 %v1564_v3, %v1551_v4 }
 0x213   :  { %v1576_v63 = vpop.f32.mrf.mxu3 }
 0x214   :  { %v1577_v0 = vadd.f32 %v1576_v63, %v1563_v61 }
 0x216   :  { %1581 = vst [vmem:[#allocation13] sm:$0xff] %v1577_v0 }
 0x21b   :  { %v1578_v6 = vpop.f32.mrf.mxu3 }
 0x21c   :  { %v1579_v7 = vadd.f32 %v1578_v6, %v1565_v5 }
 0x21e   :  { %1582 = vst [vmem:[#allocation13 + $0x8] sm:$0xff] %v1579_v7 }
 0x21f   :  { %1586 = vsyncadd [#allocation4], 128  ;;  %s1589_s11 = sshll.u32 %s2765_s7, 4  ;;  %s2653_s12 = smov [#allocation13]   ;;  %s1590_s11 = int_to_ptr.hbm [resolvable:$true] %s1589_s11 }
 0x220   :  { %s1587_s13 = sshll.u32 %s2653_s12, 4  ;;  %s1588_s13 = int_to_ptr.vmem [resolvable:$true] %s1587_s13 }
 0x221   :  { %1595 = dma.vmem_to_hbm [thread:$0]  %s1588_s13, 128, %s1590_s11, [#allocation4], %s2646_s19, %s2646_s19, %s2647_s20  }
 0x222   :  { %2639 = dma.done.wait [#allocation4], 256  }
 0x223   :  { %2640 = vsyncadd [#allocation4], 4294967040 }
 0x224   :  { %1600 = vsyncpa [#allocation3], 1 }
 0x225   :  { %1601 = vsyncpa [#allocation6], 1 }
 0x226   :  { %1602 = vsyncpa [#allocation9], 1 }
 0x227   :  { %1603 = vsyncpa [#allocation12], 1 }
 0x228   :  { %1604 = vsyncpa [#allocation4], 1 }

</bundles_post_ra>
